<compile_context>
chip_gen: v7x
topology: tpu7x:2x2x1
jax: 0.10.0
libtpu: 0.0.40
codegen_flags: <defaults>
</compile_context>

<pallas_src>
import functools

import jax
import jax.numpy as jnp
from jax.experimental import pallas as pl
from jax.experimental.pallas import tpu as pltpu


def _avgloss_kernel(a_ref, b_ref, o_ref, *, bm, rows, bpc, need_mask):
    """Accumulate partial sums of a*b into a resident (8,128) f32 output block."""
    i = pl.program_id(1)

    @pl.when(i == 0)
    def _():
        o_ref[...] = jnp.zeros_like(o_ref)

    # Cast in-register (free on the VPU); inputs arrive in their native dtype.
    prod = a_ref[...].astype(jnp.float32) * b_ref[...].astype(jnp.float32)

    if need_mask:
        # Mask rows past the true extent (tail block and/or clamped duplicate
        # blocks from the uneven 2-core split) based on the *logical* row id.
        c = pl.program_id(0)
        row_in_blk = jax.lax.broadcasted_iota(jnp.int32, (bm, 128), 0)
        global_row = (c * bpc + i) * bm + row_in_blk
        prod = jnp.where(global_row < rows, prod, jnp.float32(0.0))

    # Sum over the leading (non-layout) axis only: pure VPU adds, no XLU.
    o_ref[...] += prod.reshape(bm // 8, 8, 128).sum(axis=0)


def avg_loss(out1, out2, *, block_rows=2048):
    """Pallas equivalent of AvgLoss.forward: mean(out1 * out2) -> scalar."""
    assert out1.shape == out2.shape, "inputs must have identical shapes"
    # TODO(synk): PyTorch-style broadcasting between out1/out2 is not supported.
    total = out1.size

    out_dtype = jnp.result_type(out1.dtype, out2.dtype)
    if not jnp.issubdtype(out_dtype, jnp.floating):
        out_dtype = jnp.float32

    a = out1.reshape(-1)
    b = out2.reshape(-1)

    # Only the (rare) sub-128 residual is padded so the flat array reshapes to
    # a lane-dense (rows, 128) slab.  Zero padding is sum-safe; we divide by
    # the true element count.  Tail *row blocks* are masked in-kernel instead.
    pad = (-total) % 128
    if pad:
        a = jnp.pad(a, (0, pad))
        b = jnp.pad(b, (0, pad))

    rows = a.size // 128
    a2 = a.reshape(rows, 128)
    b2 = b.reshape(rows, 128)

    block_rows = max(8, (block_rows // 8) * 8)
    bm = min(block_rows, ((rows + 7) // 8) * 8)        # multiple of 8
    nblocks = pl.cdiv(rows, bm)

    # Shard the reduction across 2 TensorCores (v7x win; harmless on 1-TC chips).
    num_splits = 2 if nblocks >= 2 else 1
    bpc = pl.cdiv(nblocks, num_splits)                 # blocks per core
    need_mask = (num_splits * bpc * bm) != rows

    def in_map(c, i):
        # Clamp so the DMA window never runs past the array; any over-coverage
        # (uneven split / tail block) is zeroed by the in-kernel mask.
        return (jnp.minimum(c * bpc + i, nblocks - 1), 0)

    kernel = functools.partial(
        _avgloss_kernel, bm=bm, rows=rows, bpc=bpc, need_mask=need_mask)

    bytes_in = total * (out1.dtype.itemsize + out2.dtype.itemsize)
    partials = pl.pallas_call(
        kernel,
        out_shape=jax.ShapeDtypeStruct((num_splits * 8, 128), jnp.float32),
        grid_spec=pltpu.PrefetchScalarGridSpec(
            num_scalar_prefetch=0,
            grid=(num_splits, bpc),
            in_specs=[
                pl.BlockSpec((bm, 128), in_map),
                pl.BlockSpec((bm, 128), in_map),
            ],
            out_specs=pl.BlockSpec((8, 128), lambda c, i: (c, 0)),
        ),
        compiler_params=pltpu.CompilerParams(
            dimension_semantics=("parallel", "arbitrary"),
            vmem_limit_bytes=32 * 1024 * 1024,
        ),
        cost_estimate=pl.CostEstimate(
            flops=2 * total,
            transcendentals=0,
            bytes_accessed=bytes_in + num_splits * 8 * 128 * 4,
        ),
    )(a2, b2)

    # Single tiny cross-lane reduce + scale, outside the mem-bound kernel.
    mean = jnp.sum(partials, dtype=jnp.float32) * jnp.float32(1.0 / total)
    return mean.astype(out_dtype)


if __name__ == "__main__":
    key = jax.random.PRNGKey(0)
    k1, k2 = jax.random.split(key)

    # Small shapes consistent with a typical conv-output pair: NCHW = (2, 4, 16, 16)
    x1 = jax.random.normal(k1, (2, 4, 16, 16), dtype=jnp.float32)
    x2 = jax.random.normal(k2, (2, 4, 16, 16), dtype=jnp.float32)

    loss = jax.block_until_ready(avg_loss(x1, x2))

    # Reference check against plain JAX semantics (== PyTorch semantics here).
    ref = jnp.mean(x1 * x2)
    assert jnp.allclose(loss, ref, atol=1e-6, rtol=1e-5), (loss, ref)

    print("KERNEL_OK")
</pallas_src>

<mosaic_0001>
module attributes {stable_mosaic.version = 11 : i64} {
  func.func @_avgloss_kernel(%arg0: i32, %arg1: i32, %arg2: memref<16x128xf32, #tpu.memory_space<vmem>>, %arg3: memref<16x128xf32, #tpu.memory_space<vmem>>, %arg4: memref<8x128xf32, #tpu.memory_space<vmem>>) attributes {dimension_semantics = [#tpu.dimension_semantics<parallel>, #tpu.dimension_semantics<arbitrary>], iteration_bounds = array<i64: 1, 1>, scalar_prefetch = 0 : i64, scratch_operands = 0 : i64, tpu.core_type = #tpu.core_type<tc>, window_params = [{transform_indices = @transform_0, window_bounds = array<i64: 16, 128>}, {transform_indices = @transform_1, window_bounds = array<i64: 16, 128>}, {transform_indices = @transform_2, window_bounds = array<i64: 8, 128>}]} {
    %c0_i32 = arith.constant 0 : i32
    %0 = arith.cmpi eq, %arg1, %c0_i32 : i32
    %1 = arith.extui %0 : i1 to i32
    %c0_i32_0 = arith.constant 0 : i32
    %2 = arith.cmpi ne, %1, %c0_i32_0 : i32
    scf.if %2 {
      %cst_8 = arith.constant 0.000000e+00 : f32
      %11 = vector.broadcast %cst_8 : f32 to vector<8x128xf32>
      %c0_9 = arith.constant 0 : index
      %c0_10 = arith.constant 0 : index
      %12 = vector.load %arg4[%c0_9, %c0_10] : memref<8x128xf32, #tpu.memory_space<vmem>>, vector<8x128xf32>
      tpu.vector_store %arg4[%c0_9, %c0_10], %11 {strides = array<i32>} : memref<8x128xf32, #tpu.memory_space<vmem>>, vector<8x128xf32>,
    } else {
    }
    %c0 = arith.constant 0 : index
    %c0_1 = arith.constant 0 : index
    %3 = vector.load %arg2[%c0, %c0_1] : memref<16x128xf32, #tpu.memory_space<vmem>>, vector<16x128xf32>
    %c0_2 = arith.constant 0 : index
    %c0_3 = arith.constant 0 : index
    %4 = vector.load %arg3[%c0_2, %c0_3] : memref<16x128xf32, #tpu.memory_space<vmem>>, vector<16x128xf32>
    %5 = arith.mulf %3, %4 : vector<16x128xf32>
    %c0_4 = arith.constant 0 : index
    %c0_5 = arith.constant 0 : index
    %6 = vector.load %arg4[%c0_4, %c0_5] : memref<8x128xf32, #tpu.memory_space<vmem>>, vector<8x128xf32>
    %7 = vector.shape_cast %5 : vector<16x128xf32> to vector<2x8x128xf32>
    %cst = arith.constant dense<0.000000e+00> : vector<8x128xf32>
    %8 = vector.multi_reduction <add>, %7, %cst [0] : vector<2x8x128xf32> to vector<8x128xf32>
    %9 = arith.addf %6, %8 : vector<8x128xf32>
    %c0_6 = arith.constant 0 : index
    %c0_7 = arith.constant 0 : index
    %10 = vector.load %arg4[%c0_6, %c0_7] : memref<8x128xf32, #tpu.memory_space<vmem>>, vector<8x128xf32>
    tpu.vector_store %arg4[%c0_6, %c0_7], %9 {strides = array<i32>} : memref<8x128xf32, #tpu.memory_space<vmem>>, vector<8x128xf32>,
    return
  }
  func.func @transform_0(%arg0: i32, %arg1: i32) -> (i32, i32) {
    %c1_i32 = arith.constant 1 : i32
    %0 = arith.muli %arg0, %c1_i32 : i32
    %1 = arith.addi %0, %arg1 : i32
    %c0_i32 = arith.constant 0 : i32
    %2 = arith.minsi %1, %c0_i32 : i32
    %c0_i32_0 = arith.constant 0 : i32
    %c0_i32_1 = arith.constant 0 : i32
    return %2, %c0_i32_0 : i32, i32
  }
  func.func @transform_1(%arg0: i32, %arg1: i32) -> (i32, i32) {
    %c1_i32 = arith.constant 1 : i32
    %0 = arith.muli %arg0, %c1_i32 : i32
    %1 = arith.addi %0, %arg1 : i32
    %c0_i32 = arith.constant 0 : i32
    %2 = arith.minsi %1, %c0_i32 : i32
    %c0_i32_0 = arith.constant 0 : i32
    %c0_i32_1 = arith.constant 0 : i32
    return %2, %c0_i32_0 : i32, i32
  }
  func.func @transform_2(%arg0: i32, %arg1: i32) -> (i32, i32) {
    %c0_i32 = arith.constant 0 : i32
    %c0_i32_0 = arith.constant 0 : i32
    return %arg0, %c0_i32 : i32, i32
  }
}

</mosaic_0001>

<bundles_post_ra>
// kernel: tpu_custom_call.1
= control target key start
LH: loop header
LB: loop body
LE: loop exit
PB: predicated region body
PF: predicated region fallthrough
CT: control target
= control target key end

     0   :  { %7 = vsyncpa [#allocation3], 0  ;;  %s229_s0 = inlined_call_operand.hbm [shape: f32[16,128], index: 0, kind: input, shape index: {}]   ;;  %s230_s1 = inlined_call_operand.hbm [shape: f32[16,128], index: 1, kind: input, shape index: {}]   ;;  %s231_s2 = inlined_call_operand.hbm [shape: f32[8,128], index: 2, kind: output, shape index: {}]  }
   0x1   :  { %8 = vsyncpa [#allocation6], 0 }
   0x2   :  { %9 = vsyncpa [#allocation4], 0  ;;  %s173_s9 = smov [#allocation2]   ;;  %s101_s13 = scalar_lea.hbm %s229_s0, 256 }
   0x3   :  { %s21_s10 = sshll.u32 %s173_s9, 4  ;;  %p102_p0 = scmp.ne.s32.totalorder %s229_s0, %s101_s13  ;;  %s22_s10 = int_to_ptr.vmem [resolvable:$true] %s21_s10 }
   0x4   :  { %p105_p1 = scmp.lt.u32.totalorder %s101_s13, %s229_s0 }
   0x6   :  { %p107_p2 = pnand %p105_p1, %p102_p0 }
   0x8   :  { %110 = shalt.err (!%p107_p2)
}
   0x9   :  { %s111_s18 = scalar_lea.vmem %s22_s10, 256  ;;  %p116_p4 = scmp.lt.s32.totalorder %s22_s10, %s22_s10 }
   0xa   :  { %p112_p3 = scmp.ne.s32.totalorder %s22_s10, %s111_s18  ;;  %p117_p5 = scmp.lt.s32.totalorder %s111_s18, %s111_s18 }
   0xc   :  { %p118_p6 = por %p117_p5, %p116_p4 }
   0xe   :  { %p119_p7 = pnand %p118_p6, %p112_p3 }
  0x10   :  { %122 = shalt.err (!%p119_p7)
}
  0x11   :  { %s174_s19 = smov 128   ;;  %s175_s20 = smov 8  }
  0x12   :  { %27 = dma.hbm_to_vmem [thread:$0]  %s229_s0, 256, %s22_s10, [#allocation3], %s174_s19, %s174_s19, %s175_s20  }
  0x13   :  { %s176_s23 = smov [#allocation5]   ;;  %s123_s27 = scalar_lea.hbm %s230_s1, 256 }
  0x14   :  { %s39_s24 = sshll.u32 %s176_s23, 4  ;;  %p124_p8 = scmp.ne.s32.totalorder %s230_s1, %s123_s27  ;;  %s40_s24 = int_to_ptr.vmem [resolvable:$true] %s39_s24 }
  0x15   :  { %p127_p9 = scmp.lt.u32.totalorder %s123_s27, %s230_s1 }
  0x17   :  { %p129_p10 = pnand %p127_p9, %p124_p8 }
  0x19   :  { %132 = shalt.err (!%p129_p10)
}
  0x1a   :  { %s133_s4 = scalar_lea.vmem %s40_s24, 256  ;;  %p138_p12 = scmp.lt.s32.totalorder %s40_s24, %s40_s24 }
  0x1b   :  { %p134_p11 = scmp.ne.s32.totalorder %s40_s24, %s133_s4  ;;  %p139_p13 = scmp.lt.s32.totalorder %s133_s4, %s133_s4 }
  0x1d   :  { %p140_p0 = por %p139_p13, %p138_p12 }
  0x1f   :  { %p141_p1 = pnand %p140_p0, %p134_p11 }
  0x21   :  { %144 = shalt.err (!%p141_p1)
}
  0x22   :  { %45 = dma.hbm_to_vmem [thread:$0]  %s230_s1, 256, %s40_s24, [#allocation6], %s174_s19, %s174_s19, %s175_s20  }
  0x23   :  { %167 = dma.done.wait [#allocation3], 256  }
  0x24   :  { %168 = vsyncadd [#allocation3], 4294967040 }
  0x25   :  { %169 = dma.done.wait [#allocation6], 256  }
  0x26   :  { %170 = vsyncadd [#allocation6], 4294967040  ;;  %v65_v0 = vld [vmem:[#allocation2] sm:$0xff]  ;;  %v66_v1 = vld [vmem:[#allocation2 + $0x8] sm:$0xff]  ;;  %s177_s6 = smov [#allocation7]  }
  0x27   :  { %v67_v2 = vld [vmem:[#allocation5] sm:$0xff]  ;;  %v68_v3 = vld [vmem:[#allocation5 + $0x8] sm:$0xff]  ;;  %s81_s7 = sshll.u32 %s177_s6, 4  ;;  %s82_s7 = int_to_ptr.vmem [resolvable:$true] %s81_s7 }
  0x28   :  { %v69_v4 = vmul.f32 %v67_v2, %v65_v0  ;;  %v70_v5 = vmul.f32 %v68_v3, %v66_v1  ;;  %s145_s8 = scalar_lea.vmem %s82_s7, 128  ;;  %p150_p3 = scmp.lt.s32.totalorder %s82_s7, %s82_s7 }
  0x29   :  { %p146_p2 = scmp.ne.s32.totalorder %s82_s7, %s145_s8  ;;  %p151_p4 = scmp.lt.s32.totalorder %s145_s8, %s145_s8 }
  0x2a   :  { %v72_v6 = vadd.f32 %v70_v5, %v69_v4 }
  0x2b   :  { %p152_p5 = por %p151_p4, %p150_p3 }
  0x2c   :  { %74 = vst [vmem:[#allocation7] sm:$0xff] %v72_v6 }
  0x2d   :  { %p153_p6 = pnand %p152_p5, %p146_p2 }
  0x2f   :  { %156 = shalt.err (!%p153_p6)
}
  0x30   :  { %s157_s10 = scalar_lea.hbm %s231_s2, 128 }
  0x31   :  { %p158_p7 = scmp.ne.s32.totalorder %s231_s2, %s157_s10  ;;  %p161_p8 = scmp.lt.u32.totalorder %s157_s10, %s231_s2 }
  0x33   :  { %p163_p9 = pnand %p161_p8, %p158_p7 }
  0x35   :  { %166 = shalt.err (!%p163_p9)
}
  0x36   :  { %84 = dma.vmem_to_hbm [thread:$0]  %s82_s7, 128, %s231_s2, [#allocation4]  }
  0x37   :  { %171 = dma.done.wait [#allocation4], 128  }
  0x38   :  { %172 = vsyncadd [#allocation4], 4294967168 }
  0x39   :  { %88 = vsyncpa [#allocation3], 1 }
  0x3a   :  { %89 = vsyncpa [#allocation6], 1 }
  0x3b   :  { %90 = vsyncpa [#allocation4], 1 }

</bundles_post_ra>
